<compile_context>
chip_gen: v5e
topology: v5e:2x2
jax: 0.10.0
libtpu: 0.0.40
codegen_flags: <defaults>
</compile_context>

<pallas_src>
import functools

import jax
import jax.numpy as jnp
from jax.experimental import pallas as pl
from jax.experimental.pallas import tpu as pltpu


def _round_up(x: int, m: int) -> int:
    return ((x + m - 1) // m) * m


def _vmem_budgets():
    """Generation-aware budgets: (field double-buffer budget, scoped-VMEM ceiling)."""
    try:
        phys = int(pltpu.get_tpu_info().vmem_capacity_bytes)
    except Exception:
        phys = 64 << 20                      # fall back to the smallest (v7x) VMEM
    if phys >= (100 << 20):                  # v5e / v6e: 128 MiB physical
        return 48 << 20, 96 << 20
    return 20 << 20, 44 << 20                # v7x: 64 MiB physical


def _atomwise_reduce_kernel(batch_ref, field_ref, scale_ref, out_ref, acc_ref, *,
                            num_frames: int, num_atoms: int, tile_n: int,
                            tiles_per_part: int, last_block: int, mask_tail: bool):
    h = pl.program_id(1)     # atom-range split ("parallel"; feeds the 2nd TC for small D)
    i = pl.program_id(2)     # atom-tile reduction axis ("arbitrary")

    @pl.when(i == 0)
    def _():
        acc_ref[...] = jnp.zeros_like(acc_ref)

    # One-hot built directly transposed (F, TN) in the field's native dtype:
    # scatter-add == onehot^T @ field on the MXU with f32 accumulation.
    b = batch_ref[0]                                             # (1, TN) int32; pads = -1
    frame_ids = jax.lax.broadcasted_iota(jnp.int32, (num_frames, tile_n), 0)
    onehot_t = (b == frame_ids).astype(field_ref.dtype)          # (F, TN)

    def _accumulate(x):
        acc_ref[...] += jnp.dot(onehot_t, x, preferred_element_type=jnp.float32)

    if mask_tail:
        gb = h * tiles_per_part + i                              # global atom-block index
        # Only the single ragged tile (and the optional dummy tile that re-reads the same
        # block) pays the compare+select; every other step runs the plain unmasked dot.
        @pl.when(gb < last_block)
        def _():
            _accumulate(field_ref[...])

        @pl.when(gb >= last_block)
        def _():
            # The field block here is always the clamped last real block, so the row
            # offset is the static last_block * tile_n.  OOB rows may hold NaN/Inf and
            # 0 * NaN would poison the accumulator -> zero them explicitly.
            row = (jax.lax.broadcasted_iota(jnp.int32, (tile_n, 1), 0)
                   + last_block * tile_n)
            x = field_ref[...]
            _accumulate(jnp.where(row < num_atoms, x, jnp.zeros_like(x)))
    else:
        _accumulate(field_ref[...])

    @pl.when(i == tiles_per_part - 1)
    def _():
        # scale = 1 (sum), avg_num_atoms**-0.5 (normalized_sum), or 1/count (mean).
        out_ref[0] = (acc_ref[...] * scale_ref[...]).astype(out_ref.dtype)


def atomwise_reduce(field, batch, num_frames, *, reduce="sum", avg_num_atoms=None,
                    tile_n=None):
    """Pallas implementation of AtomwiseReduce.forward (batched / scatter path).

    field: (N, D) float array   batch: (N,) int array in [0, num_frames)
    Returns (num_frames, D) array of dtype field.dtype.
    """
    assert reduce in ("sum", "mean", "normalized_sum")
    constant = 1.0
    if reduce == "normalized_sum":
        assert avg_num_atoms is not None
        constant = float(avg_num_atoms) ** (-0.5)
        reduce = "sum"

    n, d = field.shape
    itemsize = jnp.dtype(field.dtype).itemsize
    sub = max(8, 8 * (4 // max(itemsize, 1)))    # sublane packing: 8 f32 / 16 bf16 / 32 i8

    batch = batch.astype(jnp.int32)

    # Per-frame scale, applied once in the finalize (hoisted out of the hot loop so no
    # per-step count accumulation and no duplicate work per feature split).
    if reduce == "mean":
        counts = jnp.zeros((num_frames,), jnp.float32).at[batch].add(1.0)
        scale = (1.0 / jnp.maximum(counts, 1.0)).reshape(num_frames, 1)  # empty frame -> 0
    else:
        scale = jnp.full((num_frames, 1), constant, jnp.float32)

    # ---- Feature split (parallel axis): each d_blk must stay a multiple of 128. ----
    if d % 256 == 0 and d >= 256:
        d_split = 2
    elif d % 128 == 0 and d >= 256:
        d_split = d // 128
    else:
        d_split = 1
    d_blk = d // d_split

    # ---- Atom tile size from a generation-aware VMEM budget. ----
    field_budget, vmem_ceiling = _vmem_budgets()
    cap = field_budget // max(1, 2 * _round_up(d_blk, 128) * itemsize)
    cap = max(128, (cap // 128) * 128)

    n_ceil = _round_up(n, sub)
    tn = int(tile_n) if tile_n is not None else 2048
    tn = min(tn, cap, n_ceil)
    if tn >= 128:
        tn = (tn // 128) * 128
    else:
        tn = _round_up(tn, sub)
    tn = max(tn, sub)

    n_tiles = pl.cdiv(n, tn)
    mask_tail = (n_tiles * tn != n)
    last_block = n_tiles - 1

    # ---- Atom-range split: gives dual-TC chips a parallel axis when D can't split. ----
    a_split = 2 if (d_split == 1 and n_tiles >= 2) else 1
    tiles_per_part = pl.cdiv(n_tiles, a_split)
    total_tiles = a_split * tiles_per_part

    # Pad ONLY the small batch array (cheap); the big field array is streamed unpadded
    # and the single ragged tile is masked inside the kernel.
    n_pad = total_tiles * tn
    if n_pad != n:
        batch = jnp.pad(batch, (0, n_pad - n), constant_values=-1)
    batch3d = batch.reshape(total_tiles, 1, tn)        # lane-dense index tiles

    partial_dtype = jnp.float32 if a_split > 1 else field.dtype
    out_itemsize = jnp.dtype(partial_dtype).itemsize

    # ---- Scoped-VMEM requirement (never budget below it). ----
    d_pad = _round_up(d_blk, 128)
    f_pad = _round_up(num_frames, 8)
    vmem_req = (2 * tn * d_pad * itemsize                              # field double-buffers
                + 2 * 8 * _round_up(tn, 128) * 4                       # batch index tiles
                + 2 * f_pad * 128 * 4                                  # resident scale block
                + 2 * f_pad * d_pad * out_itemsize                     # output block
                + f_pad * d_pad * 4                                    # f32 accumulator
                + _round_up(num_frames, sub) * _round_up(tn, 128) * itemsize  # one-hot operand
                + tn * d_pad * itemsize                                # masked tail temp
                + (2 << 20))                                           # slack
    vmem_limit = min(max(vmem_req, 16 << 20), vmem_ceiling)
    vmem_limit = int(max(vmem_limit, vmem_req))

    kernel = functools.partial(
        _atomwise_reduce_kernel,
        num_frames=num_frames, num_atoms=n, tile_n=tn,
        tiles_per_part=tiles_per_part, last_block=last_block, mask_tail=mask_tail)

    def batch_map(j, h, i):
        return (h * tiles_per_part + i, 0, 0)

    def field_map(j, h, i):
        gb = h * tiles_per_part + i
        # Clamp the (at most one) dummy tile to the last real block: the block index then
        # matches the previous step (no extra DMA) and its all(-1) batch tile makes the
        # one-hot zero, so it contributes nothing.
        return (jnp.minimum(gb, last_block), j)

    parts = pl.pallas_call(
        kernel,
        out_shape=jax.ShapeDtypeStruct((a_split, num_frames, d), partial_dtype),
        grid_spec=pltpu.PrefetchScalarGridSpec(
            num_scalar_prefetch=0,
            grid=(d_split, a_split, tiles_per_part),
            in_specs=[
                pl.BlockSpec((1, 1, tn), batch_map),                    # batch index tile
                pl.BlockSpec((tn, d_blk), field_map),                   # field tile (native dtype)
                pl.BlockSpec((num_frames, 1), lambda j, h, i: (0, 0)),  # per-frame scale (resident)
            ],
            out_specs=pl.BlockSpec((1, num_frames, d_blk), lambda j, h, i: (h, 0, j)),
            scratch_shapes=[pltpu.VMEM((num_frames, d_blk), jnp.float32)],
        ),
        compiler_params=pltpu.CompilerParams(
            dimension_semantics=("parallel", "parallel", "arbitrary"),
            vmem_limit_bytes=vmem_limit),
    )(batch3d, field, scale)

    if a_split == 1:
        return parts[0].astype(field.dtype)
    return parts.sum(axis=0).astype(field.dtype)     # tiny (a_split, F, D) epilogue add


def atomwise_reduce_no_batch(field, *, reduce="sum"):
    """AtomwiseReduce.forward when BATCH_KEY is absent: reduce over dim 0, keepdim."""
    n = field.shape[0]
    return atomwise_reduce(field, jnp.zeros((n,), jnp.int32), 1, reduce=reduce)


if __name__ == "__main__":
    key = jax.random.PRNGKey(0)
    k1, k2, k3, k4, k5, k6 = jax.random.split(key, 6)

    # --- Case 1: small shapes, all reduce modes ---
    num_atoms, feat_dim, num_frames = 16, 32, 2
    field = jax.random.normal(k1, (num_atoms, feat_dim), dtype=jnp.float32)
    batch = jax.random.randint(k2, (num_atoms,), 0, num_frames, dtype=jnp.int32)

    out_sum = atomwise_reduce(field, batch, num_frames, reduce="sum")
    jax.block_until_ready(out_sum)
    ref_sum = jax.ops.segment_sum(field, batch, num_segments=num_frames)
    assert jnp.allclose(out_sum, ref_sum, atol=1e-5), "sum mismatch"

    out_mean = atomwise_reduce(field, batch, num_frames, reduce="mean")
    jax.block_until_ready(out_mean)
    counts = jax.ops.segment_sum(jnp.ones((num_atoms, 1), jnp.float32), batch,
                                 num_segments=num_frames)
    ref_mean = ref_sum / jnp.maximum(counts, 1.0)
    assert jnp.allclose(out_mean, ref_mean, atol=1e-5), "mean mismatch"

    avg_num_atoms = 8.0
    out_nsum = atomwise_reduce(field, batch, num_frames,
                               reduce="normalized_sum", avg_num_atoms=avg_num_atoms)
    jax.block_until_ready(out_nsum)
    assert jnp.allclose(out_nsum, ref_sum * (avg_num_atoms ** -0.5), atol=1e-5), \
        "normalized_sum mismatch"

    out_nb = atomwise_reduce_no_batch(field, reduce="sum")
    jax.block_until_ready(out_nb)
    assert out_nb.shape == (1, feat_dim)
    assert jnp.allclose(out_nb, field.sum(axis=0, keepdims=True), atol=1e-5)

    # --- Case 2: ragged atom count + multiple atom tiles (atom-range split + tail mask) ---
    n2, d2, f2 = 300, 32, 3
    field2 = jax.random.normal(k3, (n2, d2), dtype=jnp.float32)
    batch2 = jax.random.randint(k4, (n2,), 0, f2, dtype=jnp.int32)
    out2 = atomwise_reduce(field2, batch2, f2, reduce="mean", tile_n=128)
    jax.block_until_ready(out2)
    ref2_sum = jax.ops.segment_sum(field2, batch2, num_segments=f2)
    ref2_cnt = jax.ops.segment_sum(jnp.ones((n2, 1), jnp.float32), batch2, num_segments=f2)
    assert jnp.allclose(out2, ref2_sum / jnp.maximum(ref2_cnt, 1.0), atol=1e-4), \
        "ragged mean mismatch"

    # --- Case 3: wide bf16 features (native-dtype MXU path + feature-dim split) ---
    n3, d3, f3 = 40, 256, 2
    field3 = jax.random.normal(k5, (n3, d3), dtype=jnp.bfloat16)
    batch3 = jax.random.randint(k6, (n3,), 0, f3, dtype=jnp.int32)
    out3 = atomwise_reduce(field3, batch3, f3, reduce="sum")
    jax.block_until_ready(out3)
    ref3 = jax.ops.segment_sum(field3.astype(jnp.float32), batch3, num_segments=f3)
    assert jnp.allclose(out3.astype(jnp.float32), ref3, atol=0.5, rtol=2e-2), \
        "bf16 sum mismatch"

    print("KERNEL_OK")
</pallas_src>

<mosaic_0001>
module attributes {stable_mosaic.version = 11 : i64} {
  func.func @_atomwise_reduce_kernel(%arg0: i32, %arg1: i32, %arg2: i32, %arg3: memref<1x1x16xi32, #tpu.memory_space<vmem>>, %arg4: memref<16x32xf32, #tpu.memory_space<vmem>>, %arg5: memref<2x1xf32, #tpu.memory_space<vmem>>, %arg6: memref<1x2x32xf32, #tpu.memory_space<vmem>>, %arg7: memref<2x32xf32, #tpu.memory_space<vmem>>) attributes {dimension_semantics = [#tpu.dimension_semantics<parallel>, #tpu.dimension_semantics<parallel>, #tpu.dimension_semantics<arbitrary>], iteration_bounds = array<i64: 1, 1, 1>, scalar_prefetch = 0 : i64, scratch_operands = 1 : i64, tpu.core_type = #tpu.core_type<tc>, window_params = [{transform_indices = @transform_0, window_bounds = array<i64: 1, 1, 16>}, {transform_indices = @transform_1, window_bounds = array<i64: 16, 32>}, {pipeline_mode = #tpu.pipeline_mode<synchronous>, transform_indices = @transform_2, window_bounds = array<i64: 2, 1>}, {transform_indices = @transform_3, window_bounds = array<i64: 1, 2, 32>}]} {
    %c0_i32 = arith.constant 0 : i32
    %0 = arith.cmpi eq, %arg2, %c0_i32 : i32
    %1 = arith.extui %0 : i1 to i32
    %c0_i32_0 = arith.constant 0 : i32
    %2 = arith.cmpi ne, %1, %c0_i32_0 : i32
    scf.if %2 {
      %cst_11 = arith.constant 0.000000e+00 : f32
      %18 = vector.broadcast %cst_11 : f32 to vector<2x32xf32>
      %c0_12 = arith.constant 0 : index
      %c0_13 = arith.constant 0 : index
      %19 = vector.load %arg7[%c0_12, %c0_13] : memref<2x32xf32, #tpu.memory_space<vmem>>, vector<2x32xf32>
      tpu.vector_store %arg7[%c0_12, %c0_13], %18 {strides = array<i32>} : memref<2x32xf32, #tpu.memory_space<vmem>>, vector<2x32xf32>,
    } else {
    }
    %c0 = arith.constant 0 : index
    %c0_1 = arith.constant 0 : index
    %c0_2 = arith.constant 0 : index
    %3 = vector.load %arg3[%c0, %c0_1, %c0_2] : memref<1x1x16xi32, #tpu.memory_space<vmem>>, vector<1x1x16xi32>
    %4 = vector.shape_cast %3 : vector<1x1x16xi32> to vector<1x16xi32>
    %5 = tpu.iota {dimensions = array<i32: 0>} : vector<2x16xi32>
    %6 = vector.broadcast %4 : vector<1x16xi32> to vector<2x16xi32>
    %7 = arith.cmpi eq, %6, %5 : vector<2x16xi32>
    %8 = arith.extui %7 : vector<2x16xi1> to vector<2x16xi32>
    %9 = arith.sitofp %8 : vector<2x16xi32> to vector<2x16xf32>
    %c0_3 = arith.constant 0 : index
    %c0_4 = arith.constant 0 : index
    %10 = vector.load %arg4[%c0_3, %c0_4] : memref<16x32xf32, #tpu.memory_space<vmem>>, vector<16x32xf32>
    %c0_5 = arith.constant 0 : index
    %c0_6 = arith.constant 0 : index
    %11 = vector.load %arg7[%c0_5, %c0_6] : memref<2x32xf32, #tpu.memory_space<vmem>>, vector<2x32xf32>
    %cst = arith.constant dense<0.000000e+00> : vector<2x32xf32>
    %12 = tpu.matmul %9, %10, %cst {dimension_numbers = #tpu.dot_dimension_numbers<[1], [0], [0], [1], [0, 0, 1, 1], [], []>} : vector<2x16xf32>, vector<16x32xf32>, vector<2x32xf32> -> vector<2x32xf32>
    %13 = arith.addf %11, %12 : vector<2x32xf32>
    %c0_7 = arith.constant 0 : index
    %c0_8 = arith.constant 0 : index
    %14 = vector.load %arg7[%c0_7, %c0_8] : memref<2x32xf32, #tpu.memory_space<vmem>>, vector<2x32xf32>
    tpu.vector_store %arg7[%c0_7, %c0_8], %13 {strides = array<i32>} : memref<2x32xf32, #tpu.memory_space<vmem>>, vector<2x32xf32>,
    %c0_i32_9 = arith.constant 0 : i32
    %15 = arith.cmpi eq, %arg2, %c0_i32_9 : i32
    %16 = arith.extui %15 : i1 to i32
    %c0_i32_10 = arith.constant 0 : i32
    %17 = arith.cmpi ne, %16, %c0_i32_10 : i32
    scf.if %17 {
      %c0_11 = arith.constant 0 : index
      %c0_12 = arith.constant 0 : index
      %18 = vector.load %arg7[%c0_11, %c0_12] : memref<2x32xf32, #tpu.memory_space<vmem>>, vector<2x32xf32>
      %c0_13 = arith.constant 0 : index
      %c0_14 = arith.constant 0 : index
      %19 = vector.load %arg5[%c0_13, %c0_14] : memref<2x1xf32, #tpu.memory_space<vmem>>, vector<2x1xf32>
      %20 = vector.broadcast %19 : vector<2x1xf32> to vector<2x32xf32>
      %21 = arith.mulf %18, %20 : vector<2x32xf32>
      %c0_15 = arith.constant 0 : index
      %c0_16 = arith.constant 0 : index
      %c0_17 = arith.constant 0 : index
      %22 = vector.load %arg6[%c0_15, %c0_16, %c0_17] : memref<1x2x32xf32, #tpu.memory_space<vmem>>, vector<1x2x32xf32>
      %23 = vector.shape_cast %22 : vector<1x2x32xf32> to vector<2x32xf32>
      %24 = vector.shape_cast %21 : vector<2x32xf32> to vector<1x2x32xf32>
      tpu.vector_store %arg6[%c0_15, %c0_16, %c0_17], %24 {strides = array<i32>} : memref<1x2x32xf32, #tpu.memory_space<vmem>>, vector<1x2x32xf32>,
    } else {
    }
    return
  }
  func.func @transform_0(%arg0: i32, %arg1: i32, %arg2: i32) -> (i32, i32, i32) {
    %c1_i32 = arith.constant 1 : i32
    %0 = arith.muli %arg1, %c1_i32 : i32
    %1 = arith.addi %0, %arg2 : i32
    %c0_i32 = arith.constant 0 : i32
    %c0_i32_0 = arith.constant 0 : i32
    %c0_i32_1 = arith.constant 0 : i32
    return %1, %c0_i32, %c0_i32_0 : i32, i32, i32
  }
  func.func @transform_1(%arg0: i32, %arg1: i32, %arg2: i32) -> (i32, i32) {
    %c1_i32 = arith.constant 1 : i32
    %0 = arith.muli %arg1, %c1_i32 : i32
    %1 = arith.addi %0, %arg2 : i32
    %c0_i32 = arith.constant 0 : i32
    %2 = arith.minsi %1, %c0_i32 : i32
    %c0_i32_0 = arith.constant 0 : i32
    return %2, %arg0 : i32, i32
  }
  func.func @transform_2(%arg0: i32, %arg1: i32, %arg2: i32) -> (i32, i32) {
    %c0_i32 = arith.constant 0 : i32
    %c0_i32_0 = arith.constant 0 : i32
    %c0_i32_1 = arith.constant 0 : i32
    return %c0_i32, %c0_i32_0 : i32, i32
  }
  func.func @transform_3(%arg0: i32, %arg1: i32, %arg2: i32) -> (i32, i32, i32) {
    %c0_i32 = arith.constant 0 : i32
    %c0_i32_0 = arith.constant 0 : i32
    return %arg1, %c0_i32, %arg0 : i32, i32, i32
  }
}

</mosaic_0001>

<bundles_post_ra>
// kernel: tpu_custom_call.1
= control target key start
LH: loop header
LB: loop body
LE: loop exit
PB: predicated region body
PF: predicated region fallthrough
CT: control target
= control target key end

     0   :  { %8 = vsyncpa [#allocation4], 0  ;;  %s235_s0 = inlined_call_operand.vmem [shape: s32[1,1,16], index: 0, kind: input, shape index: {}]   ;;  %s236_s1 = inlined_call_operand.hbm [shape: f32[16,32], index: 1, kind: input, shape index: {}]   ;;  %s237_s2 = inlined_call_operand.vmem [shape: f32[2,1], index: 2, kind: input, shape index: {}]   ;;  %s238_s3 = inlined_call_operand.hbm [shape: f32[1,2,32], index: 3, kind: output, shape index: {}]  }
   0x1   :  { %9 = vsyncpa [#allocation5], 0  ;;  %s27_s14 = sshll.u32 %s236_s1, 4  ;;  %s194_s15 = smov [#allocation3]   ;;  %s28_s14 = int_to_ptr.hbm [resolvable:$true] %s27_s14 }
   0x2   :  { %s29_s16 = sshll.u32 %s194_s15, 4  ;;  %s195_s17 = smov 128   ;;  %s30_s16 = int_to_ptr.vmem [resolvable:$true] %s29_s16 }
   0x3   :  { %s196_s18 = smov 8  }
   0x4   :  { %35 = dma.hbm_to_vmem [thread:$0]  %s28_s14, 256, %s30_s16, [#allocation4], %s195_s17, %s195_s17, %s196_s18  }
   0x5   :  { %190 = dma.done.wait [#allocation4], 256  }
   0x6   :  { %191 = vsyncadd [#allocation4], 4294967040  ;;  %vm59_vm0 = vcmask 254976   ;;  %v197_v0 = vmov 0.0   ;;  %v62_v1 = vlaneseq  ;;  %v198_v2 = vmov 0   ;;  %v69_v4 = vld [vmem:[#allocation3 + $0x8] sm:$0xff] }
   0x7   :  { %60 = vst.msk [vmem:[#allocation2] sm:$0x3] %vm59_vm0, %v197_v0  ;;  %140 = vset.pattern.permute.xlu0 %v198_v2  ;;  %v68_v5 = vld [vmem:[#allocation3] sm:$0xff]  ;;  %89 = vmatpush.msra.mxu0 %v69_v4  ;;  %v141_v6 = vld [vmem:[%s235_s0] ss:$0 sm:$0xff]  ;;  %vm71_vm1 = vcmask 130048  }
   0x8   :  { %v63_v3 = vshrl.u32 %v62_v1, 7  ;;  %v102_v7 = vld [vmem:[%s237_s2] sm:$0x3]  ;;  %s199_s22 = smov [#allocation6]   ;;  %s117_s25 = sshll.u32 %s238_s3, 4  ;;  %s118_s25 = int_to_ptr.hbm [resolvable:$true] %s117_s25 }
   0x9   :  { %105 = vperm.xlu0 %140, %v102_v7   ;;  %90 = vmatpush.msra.mxu0 %v68_v5  ;;  %s115_s23 = sshll.u32 %s199_s22, 4  ;;  %s116_s23 = int_to_ptr.vmem [resolvable:$true] %s115_s23 }
   0xa   :  { %vm65_vm2 = vcmp.eq.s32.totalorder %v141_v6, %v63_v3 }
   0xb   :  { %v132_v8 = vsel %vm65_vm2, 1.0, %v197_v0 }
   0xc   :  { %133 = vmatmul.msk.f32.vlgmr.msra.gmra.mxu0 %vm71_vm1, %v132_v8 }
   0xe   :  { %v70_v9 = vld [vmem:[#allocation2] sm:$0x3] }
  0x7b   :  { %v106_v12 = vpop.permute.xlu0 %105 }
  0x89   :  { %v92_v10 = vpop.f32.mrf.mxu0 }
  0x8a   :  { %v95_v11 = vadd.f32 %v92_v10, %v70_v9 }
  0x8c   :  { %97 = vst.msk [vmem:[#allocation2] sm:$0x3] %vm59_vm0, %v95_v11 }
  0x93   :  { %v101_v13 = vld [vmem:[#allocation2] sm:$0x3] }
  0x94   :  { %v108_v14 = vmul.f32 %v106_v12, %v101_v13 }
  0x96   :  { %109 = vst.msk [vmem:[#allocation6] sm:$0x3] %vm59_vm0, %v108_v14 }
  0x97   :  { %120 = dma.vmem_to_hbm [thread:$0]  %s116_s23, 32, %s118_s25, [#allocation5]  }
  0x98   :  { %192 = dma.done.wait [#allocation5], 32  }
  0x99   :  { %193 = vsyncadd [#allocation5], 4294967264 }
  0x9a   :  { %125 = vsyncpa [#allocation4], 1 }
  0x9b   :  { %126 = vsyncpa [#allocation5], 1 }

</bundles_post_ra>
